<compile_context>
chip_gen: v7x
topology: tpu7x:2x2x1
jax: 0.10.0
libtpu: 0.0.40
codegen_flags: <defaults>
</compile_context>

<pallas_src>
import inspect
from typing import Any, NamedTuple

import jax
import jax.numpy as jnp
from jax.experimental import pallas as pl
from jax.experimental.pallas import tpu as pltpu


def _round_up(x, m):
    return ((x + m - 1) // m) * m


def _vmem_cap_bytes():
    """Generation-aware scoped-VMEM ceiling (leave ~40% headroom)."""
    try:
        phys = int(pltpu.get_tpu_info().vmem_capacity_bytes)
    except Exception:
        phys = 128 * 1024 * 1024
    return min(int(phys * 0.6), 96 * 1024 * 1024)


def _complex_linear_kernel(x_ref, w_ref, b_ref, o_ref):
    """Grid point (c, i, j, k). o_ref (f32) doubles as the accumulator since
    its block index is constant in k (VMEM-resident across the reduction)."""
    k = pl.program_id(3)
    prod = jnp.dot(x_ref[...], w_ref[...], preferred_element_type=jnp.float32)

    @pl.when(k == 0)
    def _():
        o_ref[...] = prod          # assign: no zero-init store + reload

    @pl.when(k > 0)
    def _():
        o_ref[...] += prod

    @pl.when(k == pl.num_programs(3) - 1)
    def _():
        o_ref[...] += b_ref[...]   # bias added once, in f32


class ComplexLinearParams(NamedTuple):
    w: Any              # (2, K_pad, N_pad) compute_dtype  [real, imag]
    b: Any              # (2, 1, N_pad) f32                [real, imag]
    in_features: int
    out_features: int
    tn: int
    tk: int
    compute_dtype: Any


def prepare_params(w_real, b_real, w_imag, b_imag, *,
                   compute_dtype=jnp.float32, tn=None, tk=None):
    """One-time weight prep: stack real/imag, cast, zero-pad to tile multiples.

    Done at init/param time so each forward pays zero extra HBM passes on the
    weight stream.
    """
    in_features, out_features = w_real.shape

    if tk is None:
        tk = min(_round_up(in_features, 128), 2048)
    if tn is None:
        tn = min(_round_up(out_features, 128), 512)

    k_pad = _round_up(in_features, tk)
    n_pad = _round_up(out_features, tn)

    w = jnp.stack([w_real, w_imag], axis=0).astype(compute_dtype)  # (2, K, N)
    if (k_pad, n_pad) != (in_features, out_features):
        w = jnp.pad(w, ((0, 0), (0, k_pad - in_features),
                        (0, n_pad - out_features)))

    b = jnp.stack([b_real, b_imag], axis=0).astype(jnp.float32)
    b = b.reshape(2, 1, out_features)
    if n_pad != out_features:
        b = jnp.pad(b, ((0, 0), (0, 0), (0, n_pad - out_features)))

    return ComplexLinearParams(w=w, b=b, in_features=in_features,
                               out_features=out_features, tn=tn, tk=tk,
                               compute_dtype=compute_dtype)


def complex_linear_stacked(x2, params, *, tm=None, weight_buffers=None,
                           core_parallel_ri=False):
    """x2: (2, batch, in_features) stacked [real, imag] activations.
    Returns (2, batch, out_features) f32 (stacked -> no split copies)."""
    assert x2.shape[0] == 2 and x2.shape[2] == params.in_features
    batch = x2.shape[1]
    out_features = params.out_features
    tn, tk = params.tn, params.tk
    k_pad, n_pad = params.w.shape[1], params.w.shape[2]
    compute_dtype = params.compute_dtype
    itemsize = jnp.dtype(compute_dtype).itemsize

    # M tile rounded to the packed sublane count (8 f32 / 16 bf16 / 32 int8).
    sublane_mult = max(8, 32 // itemsize)
    if tm is None:
        tm = min(_round_up(batch, sublane_mult), 256)
    else:
        tm = _round_up(tm, sublane_mult)
    m_pad = _round_up(batch, tm)

    x2 = x2.astype(compute_dtype)
    if (m_pad, k_pad) != (batch, params.in_features):
        x2 = jnp.pad(x2, ((0, 0), (0, m_pad - batch),
                          (0, k_pad - params.in_features)))

    grid = (2, m_pad // tm, n_pad // tn, k_pad // tk)

    # Deep weight buffering only helps when the MXU step is too short to hide
    # the weight DMA (single M tile, multi-K reduction).
    if weight_buffers is None:
        weight_buffers = 3 if (grid[1] == 1 and grid[3] >= 2) else 2

    # VMEM budget (double-buffered x/out, `weight_buffers`-deep w, f32 output
    # doubling as accumulator) + headroom, capped per chip generation.
    vmem_needed = (2 * tm * tk * itemsize
                   + weight_buffers * tk * tn * itemsize
                   + 2 * tn * 4
                   + 2 * tm * tn * 4)
    vmem_limit = int(min(max(2 * vmem_needed, 16 * 1024 * 1024),
                         _vmem_cap_bytes()))

    cost = pl.CostEstimate(
        flops=2 * 2 * batch * params.in_features * out_features,
        transcendentals=0,
        bytes_accessed=int(x2.size * itemsize
                           + params.w.size * itemsize
                           + params.b.size * 4
                           + 2 * m_pad * n_pad * 4),
    )

    if core_parallel_ri:
        # Explicitly shard the real/imag axis across v7x's two TensorCores.
        dim_sem = (pltpu.CORE_PARALLEL, pltpu.PARALLEL, pltpu.PARALLEL,
                   pltpu.ARBITRARY)
    else:
        dim_sem = ("parallel", "parallel", "parallel", "arbitrary")

    supports_pipeline_mode = (
        hasattr(pl, "Buffered")
        and "pipeline_mode" in inspect.signature(pl.BlockSpec).parameters)

    def _call(wbuf):
        w_spec_kwargs = {}
        if wbuf != 2 and supports_pipeline_mode:
            w_spec_kwargs["pipeline_mode"] = pl.Buffered(wbuf)
        grid_spec = pltpu.PrefetchScalarGridSpec(
            num_scalar_prefetch=0,
            grid=grid,
            in_specs=[
                # x: (2, M, K) -> (tm, tk) tiles
                pl.BlockSpec((pl.Squeezed(), tm, tk),
                             lambda c, i, j, k: (c, i, k)),
                # w: (2, K, N) -> (tk, tn) tiles (optionally >2 buffers)
                pl.BlockSpec((pl.Squeezed(), tk, tn),
                             lambda c, i, j, k: (c, k, j),
                             **w_spec_kwargs),
                # bias: constant in k -> VMEM-resident across the reduction
                pl.BlockSpec((pl.Squeezed(), 1, tn),
                             lambda c, i, j, k: (c, 0, j)),
            ],
            out_specs=pl.BlockSpec((pl.Squeezed(), tm, tn),
                                   lambda c, i, j, k: (c, i, j)),
        )
        return pl.pallas_call(
            _complex_linear_kernel,
            out_shape=jax.ShapeDtypeStruct((2, m_pad, n_pad), jnp.float32),
            grid_spec=grid_spec,
            compiler_params=pltpu.CompilerParams(
                dimension_semantics=dim_sem,
                vmem_limit_bytes=vmem_limit,
            ),
            cost_estimate=cost,
        )(x2, params.w, params.b)

    if weight_buffers != 2:
        try:
            out = _call(weight_buffers)
        except Exception:
            out = _call(2)   # safe fallback to standard double buffering
    else:
        out = _call(2)

    # Only pay the slice copy when padding was actually applied.
    if m_pad != batch or n_pad != out_features:
        out = out[:, :batch, :out_features]
    return out


def complex_linear_split(x_real, x_imag, params, **kwargs):
    """Real/imag kept as separate f32 arrays (no complex de/interleave)."""
    x2 = jnp.stack([x_real, x_imag], axis=0)
    out = complex_linear_stacked(x2, params, **kwargs)
    return out[0], out[1]


def complex_linear(x, params, **kwargs):
    """Complex-in / complex-out wrapper matching the PyTorch forward."""
    x2 = jnp.stack([jnp.real(x), jnp.imag(x)], axis=0).astype(jnp.float32)
    out = complex_linear_stacked(x2, params, **kwargs)
    return jax.lax.complex(out[0], out[1])


def init_params(key, in_features, out_features):
    """Deterministic init mimicking nn.Linear's U(-1/sqrt(in), 1/sqrt(in))."""
    k1, k2, k3, k4 = jax.random.split(key, 4)
    bound = 1.0 / jnp.sqrt(jnp.float32(in_features))
    w_real = jax.random.uniform(k1, (in_features, out_features), jnp.float32,
                                -bound, bound)
    b_real = jax.random.uniform(k2, (out_features,), jnp.float32, -bound, bound)
    w_imag = jax.random.uniform(k3, (in_features, out_features), jnp.float32,
                                -bound, bound)
    b_imag = jax.random.uniform(k4, (out_features,), jnp.float32, -bound, bound)
    return w_real, b_real, w_imag, b_imag


if __name__ == "__main__":
    HIGH = jax.lax.Precision.HIGHEST
    key = jax.random.PRNGKey(0)
    batch, in_features, out_features = 8, 32, 32

    kx, kp = jax.random.split(key)
    kr, ki = jax.random.split(kx)
    x_real = jax.random.normal(kr, (batch, in_features), jnp.float32)
    x_imag = jax.random.normal(ki, (batch, in_features), jnp.float32)
    x = jax.lax.complex(x_real, x_imag)  # complex64 input, like torch.complex

    w_real, b_real, w_imag, b_imag = init_params(kp, in_features, out_features)

    ref_real = jnp.dot(x_real, w_real, precision=HIGH) + b_real
    ref_imag = jnp.dot(x_imag, w_imag, precision=HIGH) + b_imag
    ref = jax.lax.complex(ref_real, ref_imag)

    # f32 path (matches PyTorch numerics); weights prepared once.
    params_f32 = prepare_params(w_real, b_real, w_imag, b_imag)
    out = jax.block_until_ready(complex_linear(x, params_f32))
    assert out.shape == (batch, out_features)
    assert out.dtype == jnp.complex64
    assert jnp.allclose(out, ref, atol=1e-4, rtol=1e-4)

    # bf16 MXU fast path (f32 accumulate, f32 bias epilogue).
    params_bf16 = prepare_params(w_real, b_real, w_imag, b_imag,
                                 compute_dtype=jnp.bfloat16)
    out_bf16 = jax.block_until_ready(complex_linear(x, params_bf16))
    assert jnp.allclose(out_bf16, ref, atol=5e-2, rtol=5e-2)

    # Larger shape exercising the multi-tile (N, K) reduction grid and the
    # weight-streaming-bound regime (single M tile, multiple K tiles).
    kb = jax.random.PRNGKey(1)
    k1, k2, k3 = jax.random.split(kb, 3)
    B2, K2, N2 = 64, 384, 192
    xr2 = jax.random.normal(k1, (B2, K2), jnp.float32)
    xi2 = jax.random.normal(k2, (B2, K2), jnp.float32)
    w_r2, b_r2, w_i2, b_i2 = init_params(k3, K2, N2)
    params2 = prepare_params(w_r2, b_r2, w_i2, b_i2, tk=128, tn=128)
    or2, oi2 = complex_linear_split(xr2, xi2, params2)
    jax.block_until_ready((or2, oi2))
    assert jnp.allclose(or2, jnp.dot(xr2, w_r2, precision=HIGH) + b_r2,
                        atol=1e-3, rtol=1e-3)
    assert jnp.allclose(oi2, jnp.dot(xi2, w_i2, precision=HIGH) + b_i2,
                        atol=1e-3, rtol=1e-3)

    print("KERNEL_OK")
</pallas_src>

<mosaic_0001>
module attributes {stable_mosaic.version = 11 : i64} {
  func.func @_complex_linear_kernel(%arg0: i32, %arg1: i32, %arg2: i32, %arg3: i32, %arg4: memref<1x8x128xf32, #tpu.memory_space<vmem>>, %arg5: memref<1x128x128xf32, #tpu.memory_space<vmem>>, %arg6: memref<1x1x128xf32, #tpu.memory_space<vmem>>, %arg7: memref<1x8x128xf32, #tpu.memory_space<vmem>>) attributes {dimension_semantics = [#tpu.dimension_semantics<parallel>, #tpu.dimension_semantics<parallel>, #tpu.dimension_semantics<parallel>, #tpu.dimension_semantics<arbitrary>], iteration_bounds = array<i64: 2, 1, 1, 1>, scalar_prefetch = 0 : i64, scratch_operands = 0 : i64, tpu.core_type = #tpu.core_type<tc>, window_params = [{transform_indices = @transform_0, window_bounds = array<i64: 1, 8, 128>}, {transform_indices = @transform_1, window_bounds = array<i64: 1, 128, 128>}, {transform_indices = @transform_2, window_bounds = array<i64: 1, 1, 128>}, {transform_indices = @transform_3, window_bounds = array<i64: 1, 8, 128>}]} {
    %c0 = arith.constant 0 : index
    %c0_0 = arith.constant 0 : index
    %c0_1 = arith.constant 0 : index
    %0 = vector.load %arg4[%c0, %c0_0, %c0_1] : memref<1x8x128xf32, #tpu.memory_space<vmem>>, vector<1x8x128xf32>
    %1 = vector.shape_cast %0 : vector<1x8x128xf32> to vector<8x128xf32>
    %c0_2 = arith.constant 0 : index
    %c0_3 = arith.constant 0 : index
    %c0_4 = arith.constant 0 : index
    %2 = vector.load %arg5[%c0_2, %c0_3, %c0_4] : memref<1x128x128xf32, #tpu.memory_space<vmem>>, vector<1x128x128xf32>
    %3 = vector.shape_cast %2 : vector<1x128x128xf32> to vector<128x128xf32>
    %cst = arith.constant dense<0.000000e+00> : vector<8x128xf32>
    %4 = tpu.matmul %1, %3, %cst {dimension_numbers = #tpu.dot_dimension_numbers<[1], [0], [0], [1], [0, 0, 1, 1], [], []>} : vector<8x128xf32>, vector<128x128xf32>, vector<8x128xf32> -> vector<8x128xf32>
    %c0_i32 = arith.constant 0 : i32
    %5 = arith.cmpi eq, %arg3, %c0_i32 : i32
    %6 = arith.extui %5 : i1 to i32
    %c0_i32_5 = arith.constant 0 : i32
    %7 = arith.cmpi ne, %6, %c0_i32_5 : i32
    scf.if %7 {
      %c0_10 = arith.constant 0 : index
      %c0_11 = arith.constant 0 : index
      %c0_12 = arith.constant 0 : index
      %14 = vector.load %arg7[%c0_10, %c0_11, %c0_12] : memref<1x8x128xf32, #tpu.memory_space<vmem>>, vector<1x8x128xf32>
      %15 = vector.shape_cast %14 : vector<1x8x128xf32> to vector<8x128xf32>
      %16 = vector.shape_cast %4 : vector<8x128xf32> to vector<1x8x128xf32>
      tpu.vector_store %arg7[%c0_10, %c0_11, %c0_12], %16 {strides = array<i32>} : memref<1x8x128xf32, #tpu.memory_space<vmem>>, vector<1x8x128xf32>,
    } else {
    }
    %c0_i32_6 = arith.constant 0 : i32
    %8 = arith.cmpi sgt, %arg3, %c0_i32_6 : i32
    %9 = arith.extui %8 : i1 to i32
    %c0_i32_7 = arith.constant 0 : i32
    %10 = arith.cmpi ne, %9, %c0_i32_7 : i32
    scf.if %10 {
      %c0_10 = arith.constant 0 : index
      %c0_11 = arith.constant 0 : index
      %c0_12 = arith.constant 0 : index
      %14 = vector.load %arg7[%c0_10, %c0_11, %c0_12] : memref<1x8x128xf32, #tpu.memory_space<vmem>>, vector<1x8x128xf32>
      %15 = vector.shape_cast %14 : vector<1x8x128xf32> to vector<8x128xf32>
      %16 = arith.addf %15, %4 : vector<8x128xf32>
      %c0_13 = arith.constant 0 : index
      %c0_14 = arith.constant 0 : index
      %c0_15 = arith.constant 0 : index
      %17 = vector.load %arg7[%c0_13, %c0_14, %c0_15] : memref<1x8x128xf32, #tpu.memory_space<vmem>>, vector<1x8x128xf32>
      %18 = vector.shape_cast %17 : vector<1x8x128xf32> to vector<8x128xf32>
      %19 = vector.shape_cast %16 : vector<8x128xf32> to vector<1x8x128xf32>
      tpu.vector_store %arg7[%c0_13, %c0_14, %c0_15], %19 {strides = array<i32>} : memref<1x8x128xf32, #tpu.memory_space<vmem>>, vector<1x8x128xf32>,
    } else {
    }
    %c0_i32_8 = arith.constant 0 : i32
    %11 = arith.cmpi eq, %arg3, %c0_i32_8 : i32
    %12 = arith.extui %11 : i1 to i32
    %c0_i32_9 = arith.constant 0 : i32
    %13 = arith.cmpi ne, %12, %c0_i32_9 : i32
    scf.if %13 {
      %c0_10 = arith.constant 0 : index
      %c0_11 = arith.constant 0 : index
      %c0_12 = arith.constant 0 : index
      %14 = vector.load %arg7[%c0_10, %c0_11, %c0_12] : memref<1x8x128xf32, #tpu.memory_space<vmem>>, vector<1x8x128xf32>
      %15 = vector.shape_cast %14 : vector<1x8x128xf32> to vector<8x128xf32>
      %c0_13 = arith.constant 0 : index
      %c0_14 = arith.constant 0 : index
      %c0_15 = arith.constant 0 : index
      %16 = vector.load %arg6[%c0_13, %c0_14, %c0_15] : memref<1x1x128xf32, #tpu.memory_space<vmem>>, vector<1x1x128xf32>
      %17 = vector.shape_cast %16 : vector<1x1x128xf32> to vector<1x128xf32>
      %18 = vector.broadcast %17 : vector<1x128xf32> to vector<8x128xf32>
      %19 = arith.addf %15, %18 : vector<8x128xf32>
      %c0_16 = arith.constant 0 : index
      %c0_17 = arith.constant 0 : index
      %c0_18 = arith.constant 0 : index
      %20 = vector.load %arg7[%c0_16, %c0_17, %c0_18] : memref<1x8x128xf32, #tpu.memory_space<vmem>>, vector<1x8x128xf32>
      %21 = vector.shape_cast %20 : vector<1x8x128xf32> to vector<8x128xf32>
      %22 = vector.shape_cast %19 : vector<8x128xf32> to vector<1x8x128xf32>
      tpu.vector_store %arg7[%c0_16, %c0_17, %c0_18], %22 {strides = array<i32>} : memref<1x8x128xf32, #tpu.memory_space<vmem>>, vector<1x8x128xf32>,
    } else {
    }
    return
  }
  func.func @transform_0(%arg0: i32, %arg1: i32, %arg2: i32, %arg3: i32) -> (i32, i32, i32) {
    %c0_i32 = arith.constant 0 : i32
    return %arg0, %arg1, %arg3 : i32, i32, i32
  }
  func.func @transform_1(%arg0: i32, %arg1: i32, %arg2: i32, %arg3: i32) -> (i32, i32, i32) {
    %c0_i32 = arith.constant 0 : i32
    return %arg0, %arg3, %arg2 : i32, i32, i32
  }
  func.func @transform_2(%arg0: i32, %arg1: i32, %arg2: i32, %arg3: i32) -> (i32, i32, i32) {
    %c0_i32 = arith.constant 0 : i32
    %c0_i32_0 = arith.constant 0 : i32
    return %arg0, %c0_i32, %arg2 : i32, i32, i32
  }
  func.func @transform_3(%arg0: i32, %arg1: i32, %arg2: i32, %arg3: i32) -> (i32, i32, i32) {
    %c0_i32 = arith.constant 0 : i32
    return %arg0, %arg1, %arg2 : i32, i32, i32
  }
}

</mosaic_0001>

<bundles_post_ra>
// kernel: tpu_custom_call.1
= control target key start
LH: loop header
LB: loop body
LE: loop exit
PB: predicated region body
PF: predicated region fallthrough
CT: control target
= control target key end

     0   :  { %8 = vsyncpa [#allocation3], 0  ;;  %s1146_s0 = inlined_call_operand.hbm [shape: f32[2,8,128], index: 0, kind: input, shape index: {}]   ;;  %s1147_s1 = inlined_call_operand.hbm [shape: f32[2,128,128], index: 1, kind: input, shape index: {}]   ;;  %s1148_s2 = inlined_call_operand.vmem [shape: f32[2,1,128], index: 2, kind: input, shape index: {}]   ;;  %s1149_s3 = inlined_call_operand.hbm [shape: f32[2,8,128], index: 3, kind: output, shape index: {}]  }
   0x1   :  { %10 = vsyncpa [#allocation3 + $0x1], 0 }
   0x2   :  { %11 = vsyncpa [#allocation6], 0 }
   0x3   :  { %13 = vsyncpa [#allocation6 + $0x1], 0 }
   0x4   :  { %14 = vsyncpa [#allocation4], 0 }
   0x5   :  { %16 = vsyncpa [#allocation4 + $0x1], 0  ;;  %s893_s12 = smov 0   ;;  %s895_s13 = smov 0  }
   0x6   :  { %s897_s14 = smov 0   ;;  %s899_s15 = smov 0  }
   0x7   :  { %s901_s16 = smov 0   ;;  %s903_s17 = smov 0  }
   0x8 LB: > { %s550_s18 = sadd.s32 4294967295, %s863_s17   ;;  %s551_s19 = sadd.s32 4294967294, %s863_s17   ;;  %s863_s17 = sphi %s903_s17, %s22_s17   ;;  %s859_s16 = sphi %s901_s16, %s1168_s16   ;;  %s855_s15 = sphi %s899_s15, %s1167_s15   ;;  %s851_s14 = sphi %s897_s14, %s1166_s14   ;;  %s847_s13 = sphi %s895_s13, %s1165_s13   ;;  %s843_s12 = sphi %s893_s12, %s1164_s12  }
   0x9   : > { %s48_s20 = sadd.s32 1, %s859_s16  ;;  %s59_s21 = sadd.s32 1, %s851_s14 }
   0xa   : > { %p50_p0 = scmp.ge.s32.totalorder %s48_s20, 2  ;;  %p66_p1 = scmp.ne.s32.totalorder %s851_s14, %s847_s13 }
   0xb   : > { %p67_p2 = scmp.eq.s32.totalorder %s863_s17, 0  ;;  %p72_p3 = scmp.ne.s32.totalorder %s847_s13, %s843_s12 }
   0xc   : > { %s1170_s20 = smov (%p50_p0, %s48_s20), 0  ;;  %p73_p5 = scmp.eq.s32.totalorder %s550_s18, 0 }
   0xd   : > { %p934_p4 = por %p67_p2, %p66_p1  ;;  %s52_s23 = ssub.s32 %s859_s16, %s1170_s20 }
   0xe   : > { %p158_p6 = scmp.eq.s32.totalorder %s550_s18, 1  ;;  %p57_p7 = scmp.eq.s32.totalorder %s52_s23, 0 }
   0xf   : > { %p940_p8 = por %p73_p5, %p72_p3  ;;  %p164_p10 = scmp.eq.s32.totalorder %s551_s19, 1 }
  0x10   : > { %p944_p9 = por %p158_p6, %p66_p1  ;;  %p662_p13 = scmp.lt.s32.totalorder %s863_s17, 2 }
  0x11   : > { %s1153_s24 = scalar_select %p940_p8, 1, 0 }
  0x12   : > { %s1154_s25 = scalar_select %p944_p9, 1, 0 }
  0x13   : > { %s949_s26 = scalar_select %p57_p7, %s851_s14, %s59_s21  }
  0x14   : > { %p951_p11 = por %p164_p10, %p72_p3  ;;  %s958_s28 = sand.u32 1, %s851_s14  }
  0x15   : > { %s554_s29 = sshll.u32 %s958_s28, 3  ;;  %s555_s30 = sshll.u32 %s859_s16, 7 }
  0x16   : > { %s1155_s27 = scalar_select %p951_p11, 1, 0 }
  0x17   : > { %s965_s6 = scalar_lea.hbm %s1146_s0, %s555_s30  ;;  %s188_s7 = scalar_lea.vmem [#allocation2], %s554_s29 }
  0x18   : > { %s197_s8 = sshll.u32 %s188_s7, 4  ;;  %p971_p0 = pnand %p662_p13, %p934_p4  ;;  %s967_s8 = int_to_ptr.vmem [resolvable:$true] %s197_s8 }
  0x19   : > { %s185_s10 = scalar_lea.sflag [#allocation3], %s958_s28  ;;  %s717_s11 = scalar_lea.hbm %s965_s6, 128 }
  0x1a   : > { %p718_p3 = scmp.ne.s32.totalorder %s965_s6, %s717_s11  ;;  %p719_p5 = pneg %p971_p0 }
  0x1b   : > { %s722_s21 = scalar_lea.hbm %s1146_s0, 256  ;;  %p723_p4 = scmp.lt.u32.totalorder %s965_s6, %s1146_s0 }
  0x1c   : > { %p720_p6 = pnand %p719_p5, %p718_p3  ;;  %p724_p10 = scmp.lt.u32.totalorder %s722_s21, %s717_s11 }
  0x1d   : > { %p726_p12 = scmp.lt.u32.totalorder %s717_s11, %s965_s6 }
  0x1e   : > { %p721_p7 = pneg %p720_p6  ;;  %p725_p13 = por %p724_p10, %p723_p4 }
  0x20   : > { %p727_p1 = por %p726_p12, %p725_p13 }
  0x22   : > { %p728_p2 = pnand %p727_p1, %p721_p7 }
  0x24   : > { %731 = shalt.err (!%p728_p2)
}
  0x25   : > { %s732_s29 = scalar_lea.vmem %s967_s8, 128  ;;  %s865_s30 = smov [#allocation2]  }
  0x26   : > { %p733_p3 = scmp.ne.s32.totalorder %s967_s8, %s732_s29  ;;  %s737_s4 = sshll.u32 %s865_s30, 4  ;;  %s738_s4 = int_to_ptr.vmem [resolvable:$false] %s737_s4 }
  0x27   : > { %s739_s5 = scalar_lea.vmem %s738_s4, 256  ;;  %p740_p9 = scmp.lt.s32.totalorder %s967_s8, %s738_s4 }
  0x28   : > { %p735_p6 = pnand %p733_p3, %p719_p5  ;;  %p741_p4 = scmp.lt.s32.totalorder %s739_s5, %s732_s29 }
  0x2a   : > { %p736_p11 = pneg %p735_p6  ;;  %p742_p10 = por %p741_p4, %p740_p9 }
  0x2c   : > { %p743_p12 = pnand %p742_p10, %p736_p11 }
  0x2e   : > { %746 = shalt.err (!%p743_p12)
}
  0x2f   : > { %654 = dma.hbm_to_vmem [thread:$0]  (!%p971_p0), %s965_s6, 128, %s967_s8, %s185_s10  }
  0x30   : > { %p1157_p1 = scmp.lt.s32.totalorder %s863_s17, 3  ;;  %p1158_p2 = scmp.ge.s32.totalorder %s863_s17, 1 }
  0x31   : > { %s556_s11 = sshll.u32 %s958_s28, 7  ;;  %s568_s18 = sshll.u32 %s859_s16, 11 }
  0x32   : > { %p1007_p7 = pnand %p1158_p2, %p1157_p1  ;;  %s1016_s22 = scalar_lea.hbm %s1147_s1, %s568_s18 }
  0x33   : > { %s208_s23 = scalar_lea.vmem [#allocation5], %s556_s11  ;;  %s205_s6 = scalar_lea.sflag [#allocation6], %s958_s28 }
  0x34   : > { %s218_s29 = sshll.u32 %s208_s23, 4  ;;  %s747_s8 = scalar_lea.hbm %s1016_s22, 2048  ;;  %s1018_s29 = int_to_ptr.vmem [resolvable:$true] %s218_s29 }
  0x35   : > { %p748_p9 = scmp.ne.s32.totalorder %s1016_s22, %s747_s8  ;;  %s752_s4 = scalar_lea.hbm %s1147_s1, 4096 }
  0x36   : > { %p753_p3 = scmp.lt.u32.totalorder %s1016_s22, %s1147_s1  ;;  %p754_p6 = scmp.lt.u32.totalorder %s752_s4, %s747_s8 }
  0x37   : > { %p750_p11 = pnand %p748_p9, %p719_p5  ;;  %p756_p10 = scmp.lt.u32.totalorder %s747_s8, %s1016_s22 }
  0x38   : > { %p755_p4 = por %p754_p6, %p753_p3 }
  0x39   : > { %p751_p13 = pneg %p750_p11 }
  0x3a   : > { %p757_p12 = por %p756_p10, %p755_p4 }
  0x3c   : > { %p758_p1 = pnand %p757_p12, %p751_p13 }
  0x3e   : > { %761 = shalt.err (!%p758_p1)
}
  0x3f   : > { %s762_s11 = scalar_lea.vmem %s1018_s29, 2048  ;;  %s866_s19 = smov [#allocation5]  }
  0x40   : > { %p763_p2 = scmp.ne.s32.totalorder %s1018_s29, %s762_s11  ;;  %s767_s21 = sshll.u32 %s866_s19, 4  ;;  %s768_s21 = int_to_ptr.vmem [resolvable:$false] %s767_s21 }
  0x41   : > { %s769_s23 = scalar_lea.vmem %s768_s21, 4096  ;;  %p770_p8 = scmp.lt.s32.totalorder %s1018_s29, %s768_s21 }
  0x42   : > { %p765_p9 = pnand %p763_p2, %p719_p5  ;;  %p771_p3 = scmp.lt.s32.totalorder %s769_s23, %s762_s11 }
  0x44   : > { %p766_p11 = pneg %p765_p9  ;;  %p772_p6 = por %p771_p3, %p770_p8 }
  0x46   : > { %p773_p4 = pnand %p772_p6, %p766_p11 }
  0x48   : > { %776 = shalt.err (!%p773_p4)
}
  0x49   : > { %s867_s8 = smov 128   ;;  %s868_s10 = smov 8  }
  0x4a   : > { %657 = dma.hbm_to_vmem [thread:$0]  (!%p971_p0), %s1016_s22, 2048, %s1018_s29, %s205_s6, %s867_s8, %s867_s8, %s868_s10  }
  0x4b   : > { %239 = sbr.rel (%p1007_p7) target bundleno = 348 (0x15c), region = 32  ;;  %s1049_s30 = sand.u32 (!%p1007_p7), 1, %s847_s13  }
  0x4c   : > { %s560_s4 = sshll.u32 (!%p1007_p7), %s1049_s30, 3  ;;  %s242_s5 = scalar_lea.sflag (!%p1007_p7), [#allocation3], %s1049_s30 }
  0x4d   : > { %s1055_s18 = scalar_lea.vmem (!%p1007_p7), [#allocation2], %s560_s4  ;;  %p1160_p8 = scmp.ne.s32.totalorder (!%p1007_p7), %s1153_s24, 0 }
  0x52   : > { %830 = dma.done.wait (%p1160_p8), %s242_s5, 128  }
  0x53   : > { %832 = vsyncadd (%p1160_p8), %s242_s5, 4294967168  ;;  %s561_s28 = sshll.u32 %s1049_s30, 7  ;;  %s251_s9 = scalar_lea.sflag [#allocation6], %s1049_s30 }
  0x54   : > { %s1063_s7 = scalar_lea.vmem [#allocation5], %s561_s28 }
  0x55   : > { %834 = dma.done.wait (%p1160_p8), %s251_s9, 2048  }
  0x56   : > { %836 = vsyncadd (%p1160_p8), %s251_s9, 4294965248  ;;  %v869_v0 = vmov 0.0|0.0   ;;  %vm870_vm0 = vmmov 0   ;;  %v871_v1 = vmov 0.0   ;;  %v296_v2 = vld [vmem:[%s1063_s7] sm:$0xff]  ;;  %v297_v3 = vld [vmem:[%s1063_s7 + $0x8] sm:$0xff] }
  0x57   : > { %621 = vmatprep.subr.bf16.mxu0 %v869_v0  ;;  %618 = vmatprep.mubr.msk.f32.mxu0 %vm870_vm0, %v871_v1  ;;  %v298_v4 = vld [vmem:[%s1063_s7 + $0x10] sm:$0xff]  ;;  %v622_v5 = vpack.c.bf16 %v297_v3, %v296_v2  ;;  %v299_v6 = vld [vmem:[%s1063_s7 + $0x18] sm:$0xff]  ;;  %v300_v8 = vld [vmem:[%s1063_s7 + $0x20] sm:$0xff]  ;;  %p289_p0 = scmp.lt.s32.totalorder %s855_s15, 1  ;;  %s565_s11 = sshll.u32 %s855_s15, 7 }
  0x58   : > { %v625_v7 = vpack.c.bf16 %v299_v6, %v298_v4  ;;  %v301_v9 = vld [vmem:[%s1063_s7 + $0x28] sm:$0xff]  ;;  %v302_v11 = vld [vmem:[%s1063_s7 + $0x30] sm:$0xff]  ;;  %v303_v12 = vld [vmem:[%s1063_s7 + $0x38] sm:$0xff]  ;;  %s287_s19 = scalar_lea.vmem [#allocation7], %s560_s4  ;;  %s1097_s10 = scalar_lea.hbm %s1149_s3, %s565_s11 }
  0x59   : > { %623 = vmatpush3.bf16.msra.mxu0 %v622_v5  ;;  %v628_v10 = vpack.c.bf16 %v301_v9, %v300_v8  ;;  %v631_v13 = vpack.c.bf16 %v303_v12, %v302_v11  ;;  %v304_v14 = vld [vmem:[%s1063_s7 + $0x40] sm:$0xff]  ;;  %v305_v15 = vld [vmem:[%s1063_s7 + $0x48] sm:$0xff]  ;;  %v306_v17 = vld [vmem:[%s1063_s7 + $0x50] sm:$0xff]  ;;  %s290_s24 = scalar_select %p289_p0, %s855_s15, 1 }
  0x5a   : > { %624 = vmatprep.subr.bf16.mxu0 %v869_v0  ;;  %v634_v16 = vpack.c.bf16 %v305_v15, %v304_v14  ;;  %v307_v18 = vld [vmem:[%s1063_s7 + $0x58] sm:$0xff]  ;;  %v308_v20 = vld [vmem:[%s1063_s7 + $0x60] sm:$0xff]  ;;  %v309_v21 = vld [vmem:[%s1063_s7 + $0x68] sm:$0xff]  ;;  %s423_s21 = sshll.u32 %s287_s19, 4  ;;  %s408_s5 = scalar_lea.sflag [#allocation4], %s1049_s30  ;;  %s1099_s21 = int_to_ptr.vmem [resolvable:$true] %s423_s21 }
  0x5b   : > { %v637_v19 = vpack.c.bf16 %v307_v18, %v306_v17  ;;  %v640_v22 = vpack.c.bf16 %v309_v21, %v308_v20  ;;  %v310_v23 = vld [vmem:[%s1063_s7 + $0x70] sm:$0xff]  ;;  %v311_v24 = vld [vmem:[%s1063_s7 + $0x78] sm:$0xff]  ;;  %s294_s6 = scalar_lea.vmem %s1148_s2, %s290_s24  ;;  %p1161_p7 = scmp.ne.s32.totalorder %s1154_s25, 0 }
  0x5c   : > { %v643_v25 = vpack.c.bf16 %v311_v24, %v310_v23  ;;  %v295_v26 = vld [vmem:[%s1055_s18] sm:$0xff]  ;;  %s777_s18 = scalar_lea.vmem %s1099_s21, 128  ;;  %s872_s15 = smov [#allocation7]  }
  0x5d   : > { %626 = vmatpush3.bf16.msra.mxu0 %v625_v7  ;;  %v563_v27 = vld [vmem:[%s294_s6] ss:$0 sm:$0xff]  ;;  %p778_p5 = scmp.ne.s32.totalorder %s1099_s21, %s777_s18  ;;  %s781_s4 = sshll.u32 %s872_s15, 4  ;;  %s782_s4 = int_to_ptr.vmem [resolvable:$false] %s781_s4 }
  0x5e   : > { %627 = vmatprep.subr.bf16.mxu0 %v869_v0  ;;  %s783_s28 = scalar_lea.vmem %s782_s4, 256  ;;  %p784_p12 = scmp.lt.s32.totalorder %s1099_s21, %s782_s4 }
  0x5f   : > { %p779_p13 = pnand %p778_p5, %p1161_p7  ;;  %p785_p1 = scmp.lt.s32.totalorder %s783_s28, %s777_s18 }
  0x61   : > { %629 = vmatpush3.bf16.msra.mxu0 %v628_v10  ;;  %p780_p10 = pneg %p779_p13  ;;  %p786_p2 = por %p785_p1, %p784_p12 }
  0x62   : > { %630 = vmatprep.subr.bf16.mxu0 %v869_v0 }
  0x63   : > { %p787_p9 = pnand %p786_p2, %p780_p10 }
  0x65   : > { %632 = vmatpush3.bf16.msra.mxu0 %v631_v13 }
  0x66   : > { %633 = vmatprep.subr.bf16.mxu0 %v869_v0 }
  0x69   : > { %635 = vmatpush3.bf16.msra.mxu0 %v634_v16 }
  0x6a   : > { %636 = vmatprep.subr.bf16.mxu0 %v869_v0 }
  0x6d   : > { %638 = vmatpush3.bf16.msra.mxu0 %v637_v19 }
  0x6e   : > { %639 = vmatprep.subr.bf16.mxu0 %v869_v0 }
  0x71   : > { %641 = vmatpush3.bf16.msra.mxu0 %v640_v22 }
  0x72   : > { %642 = vmatprep.subr.bf16.mxu0 %v869_v0 }
  0x75   : > { %644 = vmatpush3.bf16.msra.mxu0 %v643_v25 }
  0x78   : > { %619 = vmatmul.mubr.f32.vlgmr.msra.gmra.mrb[0].mxu0 %v295_v26 }
 0x14b   : > { %v378_v28 = vpop.f32.mrb[0].mxu0 }
 0x14c   : > { %v405_v29 = vadd.f32 %v563_v27, %v378_v28  ;;  %v620_v30 = vpop.f32.mrb[1].mxu0 }
 0x14e   : > { %406 = vst [vmem:[%s287_s19] sm:$0xff] %v405_v29 }
 0x14f   : > { %790 = shalt.err (!%p787_p9)
}
 0x150   : > { %s791_s30 = scalar_lea.hbm %s1097_s10, 128  ;;  %s795_s24 = scalar_lea.hbm %s1149_s3, 256 }
 0x151   : > { %p792_p11 = scmp.ne.s32.totalorder %s1097_s10, %s791_s30  ;;  %p796_p4 = scmp.lt.u32.totalorder %s1097_s10, %s1149_s3 }
 0x152   : > { %p797_p8 = scmp.lt.u32.totalorder %s795_s24, %s791_s30  ;;  %p799_p5 = scmp.lt.u32.totalorder %s791_s30, %s1097_s10 }
 0x153   : > { %p793_p3 = pnand %p792_p11, %p1161_p7 }
 0x154   : > { %p798_p0 = por %p797_p8, %p796_p4 }
 0x155   : > { %p794_p6 = pneg %p793_p3 }
 0x156   : > { %p800_p13 = por %p799_p5, %p798_p0 }
 0x158   : > { %p801_p10 = pnand %p800_p13, %p794_p6 }
 0x15a   : > { %804 = shalt.err (!%p801_p10)
}
 0x15b   : > { %649 = dma.vmem_to_hbm [thread:$0]  (%p1161_p7), %s1099_s21, 128, %s1097_s10, %s408_s5  }
 0x15c PF: > { %s435_s6 = sand.u32 1, %s843_s12   ;;  %p1162_p12 = scmp.ne.s32.totalorder %s1155_s27, 0 }
 0x15d   : > { %p1163_p1 = scmp.ge.s32.totalorder %s863_s17, 2  ;;  %s436_s11 = scalar_lea.sflag [#allocation4], %s435_s6 }
 0x15f   : > { %p659_p2 = pnand %p1163_p1, %p1162_p12 }
 0x161   : > { %838 = dma.done.wait (!%p659_p2), %s436_s11, 128  }
 0x162   : > { %840 = vsyncadd (!%p659_p2), %s436_s11, 4294967168  ;;  %s22_s17 = sadd.s32 1, %s863_s17   ;;  %s1164_s12 = smov %s847_s13 }
 0x163   : > { %p19_p9 = scmp.ge.s32.totalorder %s22_s17, 4   ;;  %s1165_s13 = smov %s851_s14 }
 0x164   : > { %s1166_s14 = smov %s949_s26  ;;  %s1167_s15 = smov %s859_s16 }
 0x165   : > { %s1168_s16 = smov %s1170_s20  ;;  %21 = sbr.rel (!%p19_p9) target bundleno = 8 (0x8), region = 105 }
 0x16c   :  { %441 = vsyncpa [#allocation3], 1 }
 0x16d   :  { %443 = vsyncpa [#allocation3 + $0x1], 1 }
 0x16e   :  { %444 = vsyncpa [#allocation6], 1 }
 0x16f   :  { %446 = vsyncpa [#allocation6 + $0x1], 1 }
 0x170   :  { %447 = vsyncpa [#allocation4], 1 }
 0x171   :  { %449 = vsyncpa [#allocation4 + $0x1], 1 }

</bundles_post_ra>
